<compile_context>
chip_gen: v6e
topology: v6e:2x2x1
jax: 0.10.0
libtpu: 0.0.40
codegen_flags: <defaults>
</compile_context>

<pallas_src>
import functools
import math

import jax
import jax.numpy as jnp
from jax.experimental import pallas as pl
from jax.experimental.pallas import tpu as pltpu


# ----------------------------- hardware-aware config ----------------------------
def _vmem_limit_bytes():
    """Scoped-VMEM budget with headroom below physical VMEM (64 MiB v7x, 128 MiB v5e/v6e)."""
    try:
        cap = int(getattr(pltpu.get_tpu_info(), "vmem_capacity_bytes", 0) or 0)
    except Exception:
        cap = 0
    if cap <= 0:
        return 48 * 1024 * 1024  # safe fallback on any generation
    return int(max(32 * 1024 * 1024,
                   min(cap - 16 * 1024 * 1024, 100 * 1024 * 1024)))


_VMEM_LIMIT = _vmem_limit_bytes()


def _cparams(*sem):
    return pltpu.CompilerParams(dimension_semantics=sem,
                                vmem_limit_bytes=_VMEM_LIMIT)


def _pick_tile(n, candidates):
    for c in candidates:
        if n % c == 0:
            return c
    return n


def _pick_row_tile(rows):
    # Largest row tile that keeps >= 2 grid steps (pipeline overlap + v7x dual-TC).
    for c in (512, 256, 128, 64, 32, 16, 8):
        if rows % c == 0 and rows // c >= 2:
            return c
    # TODO(synk): pad rows to a multiple of 256 for awkward shapes instead of
    # degenerating to a single grid step.
    return rows


def _pick_ffn_tile(F, H):
    # Keep double-buffered (H,TF)+(TF,H) bf16 FFN weight slices under ~16 MiB.
    cap = max(128, (2 * 1024 * 1024) // max(H, 1))
    for c in (4096, 3072, 2048, 1536, 1024, 768, 512, 384, 256, 128):
        if c <= cap and F % c == 0:
            return c
    return F


def _const_spec(shape):
    # Grid-invariant block covering the whole array (Pallas skips the re-DMA when
    # the block index is unchanged between consecutive grid steps).
    # TODO(synk): pipeline_mode=pl.Buffered(1) would halve resident weight VMEM.
    return pl.BlockSpec(shape, lambda *_: (0,) * len(shape))


# ----------------------------- in-kernel math (f32) -----------------------------
def _layer_norm(x, g, b, eps=1e-6):
    # codertimo/BERT-pytorch LayerNorm: unbiased std, eps added to std.
    mean = jnp.mean(x, axis=-1, keepdims=True)
    var = jnp.sum((x - mean) ** 2, axis=-1, keepdims=True) / (x.shape[-1] - 1)
    return g * (x - mean) / (jnp.sqrt(var) + eps) + b   # exact divide for parity


def _gelu(x):
    # tanh-approximation GELU (BERT reference implementation).
    return 0.5 * x * (1.0 + jnp.tanh(math.sqrt(2.0 / math.pi)
                                     * (x + 0.044715 * x ** 3)))


# --------------------------- kernel 1: LN1 + fused QKV --------------------------
def ln_qkv_kernel(x_ref, g_ref, b_ref, wqkv_ref, bqkv_ref,
                  q_ref, k_ref, v_ref, *, n_heads, scale):
    x = x_ref[0]                                                  # (TS, H) f32
    H = x.shape[-1]
    dk = H // n_heads
    h = _layer_norm(x, g_ref[0], b_ref[0]).astype(jnp.bfloat16)
    qkv = jnp.dot(h, wqkv_ref[...],
                  preferred_element_type=jnp.float32) + bqkv_ref[0]   # (TS, 3H) f32
    q = (qkv[:, :H] * scale).astype(jnp.bfloat16)   # fold 1/sqrt(dk) into q
    k = qkv[:, H:2 * H].astype(jnp.bfloat16)
    v = qkv[:, 2 * H:].astype(jnp.bfloat16)
    # Head split: static lane slices -> head-major stores; no HBM transposes.
    for hd in range(n_heads):
        sl = slice(hd * dk, (hd + 1) * dk)
        q_ref[0, hd, :, :] = q[:, sl]
        k_ref[0, hd, :, :] = k[:, sl]
        v_ref[0, hd, :, :] = v[:, sl]


# -------------------- kernel 2: flash-style head-batched attention --------------
def attention_kernel(q_ref, k_ref, v_ref, bias_ref, ctx_ref, m_scr, l_scr, acc_scr):
    ki = pl.program_id(2)
    n_heads, _, dk = acc_scr.shape

    @pl.when(ki == 0)
    def _():
        m_scr[...] = jnp.full(m_scr.shape, -jnp.inf, m_scr.dtype)
        l_scr[...] = jnp.zeros(l_scr.shape, l_scr.dtype)
        acc_scr[...] = jnp.zeros(acc_scr.shape, acc_scr.dtype)

    q = q_ref[0]                        # (nh, TQ, dk) bf16, pre-scaled by 1/sqrt(dk)
    k = k_ref[0]                        # (nh, TK, dk) bf16
    v = v_ref[0]                        # (nh, TK, dk) bf16
    bias = bias_ref[0]                  # (1, TK) f32 additive key-mask bias

    s = jnp.einsum('hqd,hkd->hqk', q, k,
                   preferred_element_type=jnp.float32) + bias[None]

    m_prev = m_scr[...]
    m_new = jnp.maximum(m_prev, jnp.max(s, axis=-1, keepdims=True))
    alpha = jnp.exp(m_prev - m_new)
    p = jnp.exp(s - m_new)
    l_scr[...] = alpha * l_scr[...] + jnp.sum(p, axis=-1, keepdims=True)
    acc_scr[...] = alpha * acc_scr[...] + jnp.einsum(
        'hqk,hkd->hqd', p.astype(jnp.bfloat16), v,
        preferred_element_type=jnp.float32)
    m_scr[...] = m_new

    @pl.when(ki == pl.num_programs(2) - 1)
    def _():
        ctx = (acc_scr[...] * pl.reciprocal(l_scr[...], approx=True)
               ).astype(jnp.bfloat16)                      # (nh, TQ, dk)
        # Head merge inside VMEM -> lane-dense (TQ, H) HBM store.
        for hd in range(n_heads):
            ctx_ref[0, :, hd * dk:(hd + 1) * dk] = ctx[hd]


# ------------ kernel 3: attn out-proj + residual + LN2 + F-tiled FFN -------------
def attn_out_ffn_kernel(x_ref, ctx_ref, wo_ref, bo_ref, g_ref, b_ref,
                        w1_ref, b1_ref, w2_ref, b2_ref, o_ref,
                        y_scr, h_scr, acc_scr):
    fi = pl.program_id(1)

    @pl.when(fi == 0)
    def _():
        attn = jnp.dot(ctx_ref[...], wo_ref[...],
                       preferred_element_type=jnp.float32) + bo_ref[0]
        y = x_ref[...] + attn
        y_scr[...] = y
        h_scr[...] = _layer_norm(y, g_ref[0], b_ref[0]).astype(jnp.bfloat16)
        acc_scr[...] = jnp.zeros(acc_scr.shape, acc_scr.dtype)

    ff = _gelu(jnp.dot(h_scr[...], w1_ref[...],
                       preferred_element_type=jnp.float32) + b1_ref[0])
    acc_scr[...] += jnp.dot(ff.astype(jnp.bfloat16), w2_ref[...],
                            preferred_element_type=jnp.float32)

    @pl.when(fi == pl.num_programs(1) - 1)
    def _():
        o_ref[...] = y_scr[...] + acc_scr[...] + b2_ref[0]
    # TODO(synk): dropout layers are identity in inference mode (not emitted).


# --------------------------- output projection kernel ---------------------------
def linear_kernel(x_ref, w_ref, b_ref, o_ref):
    o_ref[...] = (jnp.dot(x_ref[...].astype(jnp.bfloat16), w_ref[...],
                          preferred_element_type=jnp.float32) + b_ref[0])


# -------------------------------- block wrapper ---------------------------------
def transformer_block(x, mask_bias, p, n_heads):
    B, S, H = x.shape
    F = p["w1"].shape[1]
    dk = H // n_heads
    rows = B * S

    TS = _pick_tile(S, (512, 256, 128, 64, 32, 16, 8))
    TQ = _pick_tile(S, (256, 128, 64, 32, 16, 8))   # large TQ: dk only part-fills MXU
    TK = _pick_tile(S, (512, 256, 128))              # KV streamed flash-style
    TR = _pick_row_tile(rows)
    TF = _pick_ffn_tile(F, H)

    # --- 1) LN1 + fused QKV projection, q/k/v head-major (no wrapper transposes) ---
    qkv_shape = jax.ShapeDtypeStruct((B, n_heads, S, dk), jnp.bfloat16)
    q4, k4, v4 = pl.pallas_call(
        functools.partial(ln_qkv_kernel, n_heads=n_heads, scale=1.0 / math.sqrt(dk)),
        out_shape=(qkv_shape, qkv_shape, qkv_shape),
        grid=(B, S // TS),
        in_specs=[pl.BlockSpec((1, TS, H), lambda b, si: (b, si, 0)),
                  _const_spec((1, H)), _const_spec((1, H)),
                  _const_spec((H, 3 * H)), _const_spec((1, 3 * H))],
        out_specs=tuple(pl.BlockSpec((1, n_heads, TS, dk),
                                     lambda b, si: (b, 0, si, 0)) for _ in range(3)),
        compiler_params=_cparams("parallel", "parallel"),
    )(x, p["ln1_g"], p["ln1_b"], p["wqkv"], p["bqkv"])

    # --- 2) flash-style attention; ctx emitted as lane-dense (TQ, H) blocks ---
    ctx = pl.pallas_call(
        attention_kernel,
        out_shape=jax.ShapeDtypeStruct((B, S, H), jnp.bfloat16),
        grid=(B, S // TQ, S // TK),
        in_specs=[pl.BlockSpec((1, n_heads, TQ, dk), lambda b, qi, ki: (b, 0, qi, 0)),
                  pl.BlockSpec((1, n_heads, TK, dk), lambda b, qi, ki: (b, 0, ki, 0)),
                  pl.BlockSpec((1, n_heads, TK, dk), lambda b, qi, ki: (b, 0, ki, 0)),
                  pl.BlockSpec((1, 1, TK), lambda b, qi, ki: (b, 0, ki))],
        out_specs=pl.BlockSpec((1, TQ, H), lambda b, qi, ki: (b, qi, 0)),
        scratch_shapes=[pltpu.VMEM((n_heads, TQ, 1), jnp.float32),
                        pltpu.VMEM((n_heads, TQ, 1), jnp.float32),
                        pltpu.VMEM((n_heads, TQ, dk), jnp.float32)],
        compiler_params=_cparams("parallel", "parallel", "arbitrary"),
    )(q4, k4, v4, mask_bias)

    x2 = x.reshape(rows, H)
    ctx2 = ctx.reshape(rows, H)   # free: ctx is already lane-dense (B, S, H)

    # --- 3) attn out-proj + residual + LN2 + F-tiled FFN + residual ---
    out2 = pl.pallas_call(
        attn_out_ffn_kernel,
        out_shape=jax.ShapeDtypeStruct((rows, H), jnp.float32),
        grid=(rows // TR, F // TF),
        in_specs=[pl.BlockSpec((TR, H), lambda i, f: (i, 0)),
                  pl.BlockSpec((TR, H), lambda i, f: (i, 0)),
                  _const_spec((H, H)), _const_spec((1, H)),
                  _const_spec((1, H)), _const_spec((1, H)),
                  pl.BlockSpec((H, TF), lambda i, f: (0, f)),
                  pl.BlockSpec((1, TF), lambda i, f: (0, f)),
                  pl.BlockSpec((TF, H), lambda i, f: (f, 0)),
                  _const_spec((1, H))],
        out_specs=pl.BlockSpec((TR, H), lambda i, f: (i, 0)),
        scratch_shapes=[pltpu.VMEM((TR, H), jnp.float32),
                        pltpu.VMEM((TR, H), jnp.bfloat16),
                        pltpu.VMEM((TR, H), jnp.float32)],
        compiler_params=_cparams("parallel", "arbitrary"),
    )(x2, ctx2, p["wo"], p["bo"], p["ln2_g"], p["ln2_b"],
      p["w1"], p["b1"], p["w2"], p["b2"])

    return out2.reshape(B, S, H)


def output_projection(x, w_bf16, b):
    B, S, H = x.shape
    Dout = w_bf16.shape[1]
    rows = B * S
    TR = _pick_row_tile(rows)
    x2 = x.reshape(rows, H)
    out = pl.pallas_call(
        linear_kernel,
        out_shape=jax.ShapeDtypeStruct((rows, Dout), jnp.float32),
        grid=(rows // TR,),
        in_specs=[pl.BlockSpec((TR, H), lambda i: (i, 0)),
                  _const_spec((H, Dout)),
                  _const_spec((1, Dout))],
        out_specs=pl.BlockSpec((TR, Dout), lambda i: (i, 0)),
        compiler_params=_cparams("parallel"),
    )(x2, w_bf16, b)
    return out.reshape(B, S, Dout)


# ------------------------------ embedding (glue) ------------------------------
def sinusoidal_pos_embedding(seq_len, d_model):
    position = jnp.arange(seq_len, dtype=jnp.float32)[:, None]
    div_term = jnp.exp(jnp.arange(0, d_model, 2, dtype=jnp.float32)
                       * (-math.log(10000.0) / d_model))
    pe = jnp.zeros((seq_len, d_model), jnp.float32)
    pe = pe.at[:, 0::2].set(jnp.sin(position * div_term))
    pe = pe.at[:, 1::2].set(jnp.cos(position * div_term))
    return pe


def init_params(key, vocab_size, hidden, n_layers, ffn, out_dim, max_len):
    keys = jax.random.split(key, 4 + n_layers)

    def normal(k, shape, scale=0.02):
        return (scale * jax.random.normal(k, shape)).astype(jnp.float32)

    def wbf16(k, shape):
        # Big matmul weights live in HBM as bf16 (halves DMA bytes / VMEM).
        return normal(k, shape).astype(jnp.bfloat16)

    tok = normal(keys[0], (vocab_size, hidden)).at[0].set(0.0)   # padding_idx=0
    seg = normal(keys[1], (3, hidden)).at[0].set(0.0)            # padding_idx=0
    pos = sinusoidal_pos_embedding(max_len, hidden)

    layers = []
    for li in range(n_layers):
        lk = jax.random.split(keys[4 + li], 6)
        layers.append(dict(
            # Fused QKV weight (H, 3H) / bias (1, 3H).
            wqkv=jnp.concatenate([wbf16(lk[0], (hidden, hidden)),
                                  wbf16(lk[1], (hidden, hidden)),
                                  wbf16(lk[2], (hidden, hidden))], axis=1),
            bqkv=jnp.zeros((1, 3 * hidden), jnp.float32),
            wo=wbf16(lk[3], (hidden, hidden)), bo=jnp.zeros((1, hidden), jnp.float32),
            ln1_g=jnp.ones((1, hidden), jnp.float32), ln1_b=jnp.zeros((1, hidden), jnp.float32),
            w1=wbf16(lk[4], (hidden, ffn)), b1=jnp.zeros((1, ffn), jnp.float32),
            w2=wbf16(lk[5], (ffn, hidden)), b2=jnp.zeros((1, hidden), jnp.float32),
            ln2_g=jnp.ones((1, hidden), jnp.float32), ln2_b=jnp.zeros((1, hidden), jnp.float32),
        ))
    out_w = wbf16(keys[2], (hidden, out_dim))
    out_b = jnp.zeros((1, out_dim), jnp.float32)
    return dict(tok_emb=tok, seg_emb=seg, pos_emb=pos,
                layers=layers, out_w=out_w, out_b=out_b)


def bert_forward(params, token_ids, segment_info, attention_mask, n_heads):
    B, S = token_ids.shape
    # BERTEmbedding: token + sinusoidal position + segment (dropout = identity).
    # Gather lookups stay in plain JAX (glue); matmul/attention hot path is Pallas.
    tok = jnp.take(params["tok_emb"], token_ids, axis=0)       # (B,S,H)
    seg = jnp.take(params["seg_emb"], segment_info, axis=0)    # (B,S,H)
    pos = params["pos_emb"][None, :S, :]                       # (1,S,H)
    x = (tok + pos + seg).astype(jnp.float32)

    # mask.unsqueeze(1).unsqueeze(2) -> key-axis mask; hoisted to an additive bias.
    mask_bias = ((attention_mask.astype(jnp.float32) - 1.0) * 1e9)[:, None, :]  # (B,1,S)

    for layer in params["layers"]:
        x = transformer_block(x, mask_bias, layer, n_heads)

    return output_projection(x, params["out_w"], params["out_b"])


if __name__ == "__main__":
    B, S = 2, 8
    HIDDEN, N_LAYERS, N_HEADS = 32, 2, 4
    VOCAB = 100
    OUT_DIM = 768  # nn.Linear(hidden, 768) in the reference module

    key = jax.random.PRNGKey(0)
    pkey, tkey, skey = jax.random.split(key, 3)
    params = init_params(pkey, VOCAB, HIDDEN, N_LAYERS, HIDDEN * 4, OUT_DIM, max_len=S)

    token_ids = jax.random.randint(tkey, (B, S), 1, VOCAB)
    segment_info = jax.random.randint(skey, (B, S), 0, 2)
    attention_mask = jnp.ones((B, S), jnp.int32).at[:, S - 2:].set(0)  # last 2 = padding

    out = bert_forward(params, token_ids, segment_info, attention_mask, N_HEADS)
    out = jax.block_until_ready(out)
    assert out.shape == (B, S, OUT_DIM) and out.dtype == jnp.float32
    assert bool(jnp.all(jnp.isfinite(out)))
    print("KERNEL_OK")
</pallas_src>

<mosaic_0001>
module attributes {stable_mosaic.version = 11 : i64} {
  func.func @ln_qkv_kernel(%arg0: i32, %arg1: i32, %arg2: memref<1x8x32xf32, #tpu.memory_space<vmem>>, %arg3: memref<1x32xf32, #tpu.memory_space<vmem>>, %arg4: memref<1x32xf32, #tpu.memory_space<vmem>>, %arg5: memref<32x96xbf16, #tpu.memory_space<vmem>>, %arg6: memref<1x96xf32, #tpu.memory_space<vmem>>, %arg7: memref<1x4x8x8xbf16, #tpu.memory_space<vmem>>, %arg8: memref<1x4x8x8xbf16, #tpu.memory_space<vmem>>, %arg9: memref<1x4x8x8xbf16, #tpu.memory_space<vmem>>) attributes {dimension_semantics = [#tpu.dimension_semantics<parallel>, #tpu.dimension_semantics<parallel>], iteration_bounds = array<i64: 2, 1>, scalar_prefetch = 0 : i64, scratch_operands = 0 : i64, tpu.core_type = #tpu.core_type<tc>, window_params = [{transform_indices = @transform_0, window_bounds = array<i64: 1, 8, 32>}, {pipeline_mode = #tpu.pipeline_mode<synchronous>, transform_indices = @transform_1, window_bounds = array<i64: 1, 32>}, {pipeline_mode = #tpu.pipeline_mode<synchronous>, transform_indices = @transform_2, window_bounds = array<i64: 1, 32>}, {pipeline_mode = #tpu.pipeline_mode<synchronous>, transform_indices = @transform_3, window_bounds = array<i64: 32, 96>}, {pipeline_mode = #tpu.pipeline_mode<synchronous>, transform_indices = @transform_4, window_bounds = array<i64: 1, 96>}, {transform_indices = @transform_5, window_bounds = array<i64: 1, 4, 8, 8>}, {transform_indices = @transform_6, window_bounds = array<i64: 1, 4, 8, 8>}, {transform_indices = @transform_7, window_bounds = array<i64: 1, 4, 8, 8>}]} {
    %c0 = arith.constant 0 : index
    %c0_0 = arith.constant 0 : index
    %c0_1 = arith.constant 0 : index
    %0 = vector.load %arg2[%c0, %c0_0, %c0_1] : memref<1x8x32xf32, #tpu.memory_space<vmem>>, vector<1x8x32xf32>
    %1 = vector.shape_cast %0 : vector<1x8x32xf32> to vector<8x32xf32>
    %c0_2 = arith.constant 0 : index
    %c0_3 = arith.constant 0 : index
    %2 = vector.load %arg3[%c0_2, %c0_3] : memref<1x32xf32, #tpu.memory_space<vmem>>, vector<1x32xf32>
    %3 = vector.shape_cast %2 : vector<1x32xf32> to vector<32xf32>
    %c0_4 = arith.constant 0 : index
    %c0_5 = arith.constant 0 : index
    %4 = vector.load %arg4[%c0_4, %c0_5] : memref<1x32xf32, #tpu.memory_space<vmem>>, vector<1x32xf32>
    %5 = vector.shape_cast %4 : vector<1x32xf32> to vector<32xf32>
    %cst = arith.constant dense<0.000000e+00> : vector<8xf32>
    %6 = vector.multi_reduction <add>, %1, %cst [1] : vector<8x32xf32> to vector<8xf32>
    %7 = vector.shape_cast %6 : vector<8xf32> to vector<8x1xf32>
    %cst_6 = arith.constant 3.200000e+01 : f32
    %8 = vector.broadcast %cst_6 : f32 to vector<8x1xf32>
    %9 = arith.divf %7, %8 : vector<8x1xf32>
    %10 = vector.broadcast %9 : vector<8x1xf32> to vector<8x32xf32>
    %11 = arith.subf %1, %10 : vector<8x32xf32>
    %12 = arith.mulf %11, %11 : vector<8x32xf32>
    %cst_7 = arith.constant dense<0.000000e+00> : vector<8xf32>
    %13 = vector.multi_reduction <add>, %12, %cst_7 [1] : vector<8x32xf32> to vector<8xf32>
    %14 = vector.shape_cast %13 : vector<8xf32> to vector<8x1xf32>
    %cst_8 = arith.constant 3.100000e+01 : f32
    %15 = vector.broadcast %cst_8 : f32 to vector<8x1xf32>
    %16 = arith.divf %14, %15 : vector<8x1xf32>
    %17 = vector.broadcast %9 : vector<8x1xf32> to vector<8x32xf32>
    %18 = arith.subf %1, %17 : vector<8x32xf32>
    %19 = vector.shape_cast %3 : vector<32xf32> to vector<1x32xf32>
    %20 = vector.broadcast %19 : vector<1x32xf32> to vector<8x32xf32>
    %21 = arith.mulf %20, %18 : vector<8x32xf32>
    %22 = math.sqrt %16 : vector<8x1xf32>
    %cst_9 = arith.constant 9.99999997E-7 : f32
    %23 = vector.broadcast %cst_9 : f32 to vector<8x1xf32>
    %24 = arith.addf %22, %23 : vector<8x1xf32>
    %25 = vector.broadcast %24 : vector<8x1xf32> to vector<8x32xf32>
    %26 = arith.divf %21, %25 : vector<8x32xf32>
    %27 = vector.shape_cast %5 : vector<32xf32> to vector<1x32xf32>
    %28 = vector.broadcast %27 : vector<1x32xf32> to vector<8x32xf32>
    %29 = arith.addf %26, %28 : vector<8x32xf32>
    %30 = arith.truncf %29 : vector<8x32xf32> to vector<8x32xbf16>
    %c0_10 = arith.constant 0 : index
    %c0_11 = arith.constant 0 : index
    %31 = vector.load %arg5[%c0_10, %c0_11] : memref<32x96xbf16, #tpu.memory_space<vmem>>, vector<32x96xbf16>
    %cst_12 = arith.constant dense<0.000000e+00> : vector<8x96xf32>
    %32 = tpu.matmul %30, %31, %cst_12 {dimension_numbers = #tpu.dot_dimension_numbers<[1], [0], [0], [1], [0, 0, 1, 1], [], []>} : vector<8x32xbf16>, vector<32x96xbf16>, vector<8x96xf32> -> vector<8x96xf32>
    %c0_13 = arith.constant 0 : index
    %c0_14 = arith.constant 0 : index
    %33 = vector.load %arg6[%c0_13, %c0_14] : memref<1x96xf32, #tpu.memory_space<vmem>>, vector<1x96xf32>
    %34 = vector.shape_cast %33 : vector<1x96xf32> to vector<96xf32>
    %35 = vector.shape_cast %34 : vector<96xf32> to vector<1x96xf32>
    %36 = vector.broadcast %35 : vector<1x96xf32> to vector<8x96xf32>
    %37 = arith.addf %32, %36 : vector<8x96xf32>
    %38 = vector.extract_strided_slice %37 {offsets = [0, 0], sizes = [8, 32], strides = [1, 1]} : vector<8x96xf32> to vector<8x32xf32>
    %cst_15 = arith.constant 0.353553385 : f32
    %39 = vector.broadcast %cst_15 : f32 to vector<8x32xf32>
    %40 = arith.mulf %38, %39 : vector<8x32xf32>
    %41 = arith.truncf %40 : vector<8x32xf32> to vector<8x32xbf16>
    %42 = vector.extract_strided_slice %37 {offsets = [0, 32], sizes = [8, 32], strides = [1, 1]} : vector<8x96xf32> to vector<8x32xf32>
    %43 = arith.truncf %42 : vector<8x32xf32> to vector<8x32xbf16>
    %44 = vector.extract_strided_slice %37 {offsets = [0, 64], sizes = [8, 32], strides = [1, 1]} : vector<8x96xf32> to vector<8x32xf32>
    %45 = arith.truncf %44 : vector<8x32xf32> to vector<8x32xbf16>
    %46 = vector.extract_strided_slice %41 {offsets = [0, 0], sizes = [8, 8], strides = [1, 1]} : vector<8x32xbf16> to vector<8x8xbf16>
    %c0_16 = arith.constant 0 : index
    %c0_17 = arith.constant 0 : index
    %c0_18 = arith.constant 0 : index
    %c0_19 = arith.constant 0 : index
    %47 = vector.load %arg7[%c0_16, %c0_17, %c0_18, %c0_19] : memref<1x4x8x8xbf16, #tpu.memory_space<vmem>>, vector<1x1x8x8xbf16>
    %48 = vector.shape_cast %47 : vector<1x1x8x8xbf16> to vector<8x8xbf16>
    %49 = vector.shape_cast %46 : vector<8x8xbf16> to vector<1x1x8x8xbf16>
    tpu.vector_store %arg7[%c0_16, %c0_17, %c0_18, %c0_19], %49 {strides = array<i32>} : memref<1x4x8x8xbf16, #tpu.memory_space<vmem>>, vector<1x1x8x8xbf16>,
    %50 = vector.extract_strided_slice %43 {offsets = [0, 0], sizes = [8, 8], strides = [1, 1]} : vector<8x32xbf16> to vector<8x8xbf16>
    %c0_20 = arith.constant 0 : index
    %c0_21 = arith.constant 0 : index
    %c0_22 = arith.constant 0 : index
    %c0_23 = arith.constant 0 : index
    %51 = vector.load %arg8[%c0_20, %c0_21, %c0_22, %c0_23] : memref<1x4x8x8xbf16, #tpu.memory_space<vmem>>, vector<1x1x8x8xbf16>
    %52 = vector.shape_cast %51 : vector<1x1x8x8xbf16> to vector<8x8xbf16>
    %53 = vector.shape_cast %50 : vector<8x8xbf16> to vector<1x1x8x8xbf16>
    tpu.vector_store %arg8[%c0_20, %c0_21, %c0_22, %c0_23], %53 {strides = array<i32>} : memref<1x4x8x8xbf16, #tpu.memory_space<vmem>>, vector<1x1x8x8xbf16>,
    %54 = vector.extract_strided_slice %45 {offsets = [0, 0], sizes = [8, 8], strides = [1, 1]} : vector<8x32xbf16> to vector<8x8xbf16>
    %c0_24 = arith.constant 0 : index
    %c0_25 = arith.constant 0 : index
    %c0_26 = arith.constant 0 : index
    %c0_27 = arith.constant 0 : index
    %55 = vector.load %arg9[%c0_24, %c0_25, %c0_26, %c0_27] : memref<1x4x8x8xbf16, #tpu.memory_space<vmem>>, vector<1x1x8x8xbf16>
    %56 = vector.shape_cast %55 : vector<1x1x8x8xbf16> to vector<8x8xbf16>
    %57 = vector.shape_cast %54 : vector<8x8xbf16> to vector<1x1x8x8xbf16>
    tpu.vector_store %arg9[%c0_24, %c0_25, %c0_26, %c0_27], %57 {strides = array<i32>} : memref<1x4x8x8xbf16, #tpu.memory_space<vmem>>, vector<1x1x8x8xbf16>,
    %58 = vector.extract_strided_slice %41 {offsets = [0, 8], sizes = [8, 8], strides = [1, 1]} : vector<8x32xbf16> to vector<8x8xbf16>
    %c0_28 = arith.constant 0 : index
    %c1 = arith.constant 1 : index
    %c0_29 = arith.constant 0 : index
    %c0_30 = arith.constant 0 : index
    %59 = vector.load %arg7[%c0_28, %c1, %c0_29, %c0_30] : memref<1x4x8x8xbf16, #tpu.memory_space<vmem>>, vector<1x1x8x8xbf16>
    %60 = vector.shape_cast %59 : vector<1x1x8x8xbf16> to vector<8x8xbf16>
    %61 = vector.shape_cast %58 : vector<8x8xbf16> to vector<1x1x8x8xbf16>
    tpu.vector_store %arg7[%c0_28, %c1, %c0_29, %c0_30], %61 {strides = array<i32>} : memref<1x4x8x8xbf16, #tpu.memory_space<vmem>>, vector<1x1x8x8xbf16>,
    %62 = vector.extract_strided_slice %43 {offsets = [0, 8], sizes = [8, 8], strides = [1, 1]} : vector<8x32xbf16> to vector<8x8xbf16>
    %c0_31 = arith.constant 0 : index
    %c1_32 = arith.constant 1 : index
    %c0_33 = arith.constant 0 : index
    %c0_34 = arith.constant 0 : index
    %63 = vector.load %arg8[%c0_31, %c1_32, %c0_33, %c0_34] : memref<1x4x8x8xbf16, #tpu.memory_space<vmem>>, vector<1x1x8x8xbf16>
    %64 = vector.shape_cast %63 : vector<1x1x8x8xbf16> to vector<8x8xbf16>
    %65 = vector.shape_cast %62 : vector<8x8xbf16> to vector<1x1x8x8xbf16>
    tpu.vector_store %arg8[%c0_31, %c1_32, %c0_33, %c0_34], %65 {strides = array<i32>} : memref<1x4x8x8xbf16, #tpu.memory_space<vmem>>, vector<1x1x8x8xbf16>,
    %66 = vector.extract_strided_slice %45 {offsets = [0, 8], sizes = [8, 8], strides = [1, 1]} : vector<8x32xbf16> to vector<8x8xbf16>
    %c0_35 = arith.constant 0 : index
    %c1_36 = arith.constant 1 : index
    %c0_37 = arith.constant 0 : index
    %c0_38 = arith.constant 0 : index
    %67 = vector.load %arg9[%c0_35, %c1_36, %c0_37, %c0_38] : memref<1x4x8x8xbf16, #tpu.memory_space<vmem>>, vector<1x1x8x8xbf16>
    %68 = vector.shape_cast %67 : vector<1x1x8x8xbf16> to vector<8x8xbf16>
    %69 = vector.shape_cast %66 : vector<8x8xbf16> to vector<1x1x8x8xbf16>
    tpu.vector_store %arg9[%c0_35, %c1_36, %c0_37, %c0_38], %69 {strides = array<i32>} : memref<1x4x8x8xbf16, #tpu.memory_space<vmem>>, vector<1x1x8x8xbf16>,
    %70 = vector.extract_strided_slice %41 {offsets = [0, 16], sizes = [8, 8], strides = [1, 1]} : vector<8x32xbf16> to vector<8x8xbf16>
    %c0_39 = arith.constant 0 : index
    %c2 = arith.constant 2 : index
    %c0_40 = arith.constant 0 : index
    %c0_41 = arith.constant 0 : index
    %71 = vector.load %arg7[%c0_39, %c2, %c0_40, %c0_41] : memref<1x4x8x8xbf16, #tpu.memory_space<vmem>>, vector<1x1x8x8xbf16>
    %72 = vector.shape_cast %71 : vector<1x1x8x8xbf16> to vector<8x8xbf16>
    %73 = vector.shape_cast %70 : vector<8x8xbf16> to vector<1x1x8x8xbf16>
    tpu.vector_store %arg7[%c0_39, %c2, %c0_40, %c0_41], %73 {strides = array<i32>} : memref<1x4x8x8xbf16, #tpu.memory_space<vmem>>, vector<1x1x8x8xbf16>,
    %74 = vector.extract_strided_slice %43 {offsets = [0, 16], sizes = [8, 8], strides = [1, 1]} : vector<8x32xbf16> to vector<8x8xbf16>
    %c0_42 = arith.constant 0 : index
    %c2_43 = arith.constant 2 : index
    %c0_44 = arith.constant 0 : index
    %c0_45 = arith.constant 0 : index
    %75 = vector.load %arg8[%c0_42, %c2_43, %c0_44, %c0_45] : memref<1x4x8x8xbf16, #tpu.memory_space<vmem>>, vector<1x1x8x8xbf16>
    %76 = vector.shape_cast %75 : vector<1x1x8x8xbf16> to vector<8x8xbf16>
    %77 = vector.shape_cast %74 : vector<8x8xbf16> to vector<1x1x8x8xbf16>
    tpu.vector_store %arg8[%c0_42, %c2_43, %c0_44, %c0_45], %77 {strides = array<i32>} : memref<1x4x8x8xbf16, #tpu.memory_space<vmem>>, vector<1x1x8x8xbf16>,
    %78 = vector.extract_strided_slice %45 {offsets = [0, 16], sizes = [8, 8], strides = [1, 1]} : vector<8x32xbf16> to vector<8x8xbf16>
    %c0_46 = arith.constant 0 : index
    %c2_47 = arith.constant 2 : index
    %c0_48 = arith.constant 0 : index
    %c0_49 = arith.constant 0 : index
    %79 = vector.load %arg9[%c0_46, %c2_47, %c0_48, %c0_49] : memref<1x4x8x8xbf16, #tpu.memory_space<vmem>>, vector<1x1x8x8xbf16>
    %80 = vector.shape_cast %79 : vector<1x1x8x8xbf16> to vector<8x8xbf16>
    %81 = vector.shape_cast %78 : vector<8x8xbf16> to vector<1x1x8x8xbf16>
    tpu.vector_store %arg9[%c0_46, %c2_47, %c0_48, %c0_49], %81 {strides = array<i32>} : memref<1x4x8x8xbf16, #tpu.memory_space<vmem>>, vector<1x1x8x8xbf16>,
    %82 = vector.extract_strided_slice %41 {offsets = [0, 24], sizes = [8, 8], strides = [1, 1]} : vector<8x32xbf16> to vector<8x8xbf16>
    %c0_50 = arith.constant 0 : index
    %c3 = arith.constant 3 : index
    %c0_51 = arith.constant 0 : index
    %c0_52 = arith.constant 0 : index
    %83 = vector.load %arg7[%c0_50, %c3, %c0_51, %c0_52] : memref<1x4x8x8xbf16, #tpu.memory_space<vmem>>, vector<1x1x8x8xbf16>
    %84 = vector.shape_cast %83 : vector<1x1x8x8xbf16> to vector<8x8xbf16>
    %85 = vector.shape_cast %82 : vector<8x8xbf16> to vector<1x1x8x8xbf16>
    tpu.vector_store %arg7[%c0_50, %c3, %c0_51, %c0_52], %85 {strides = array<i32>} : memref<1x4x8x8xbf16, #tpu.memory_space<vmem>>, vector<1x1x8x8xbf16>,
    %86 = vector.extract_strided_slice %43 {offsets = [0, 24], sizes = [8, 8], strides = [1, 1]} : vector<8x32xbf16> to vector<8x8xbf16>
    %c0_53 = arith.constant 0 : index
    %c3_54 = arith.constant 3 : index
    %c0_55 = arith.constant 0 : index
    %c0_56 = arith.constant 0 : index
    %87 = vector.load %arg8[%c0_53, %c3_54, %c0_55, %c0_56] : memref<1x4x8x8xbf16, #tpu.memory_space<vmem>>, vector<1x1x8x8xbf16>
    %88 = vector.shape_cast %87 : vector<1x1x8x8xbf16> to vector<8x8xbf16>
    %89 = vector.shape_cast %86 : vector<8x8xbf16> to vector<1x1x8x8xbf16>
    tpu.vector_store %arg8[%c0_53, %c3_54, %c0_55, %c0_56], %89 {strides = array<i32>} : memref<1x4x8x8xbf16, #tpu.memory_space<vmem>>, vector<1x1x8x8xbf16>,
    %90 = vector.extract_strided_slice %45 {offsets = [0, 24], sizes = [8, 8], strides = [1, 1]} : vector<8x32xbf16> to vector<8x8xbf16>
    %c0_57 = arith.constant 0 : index
    %c3_58 = arith.constant 3 : index
    %c0_59 = arith.constant 0 : index
    %c0_60 = arith.constant 0 : index
    %91 = vector.load %arg9[%c0_57, %c3_58, %c0_59, %c0_60] : memref<1x4x8x8xbf16, #tpu.memory_space<vmem>>, vector<1x1x8x8xbf16>
    %92 = vector.shape_cast %91 : vector<1x1x8x8xbf16> to vector<8x8xbf16>
    %93 = vector.shape_cast %90 : vector<8x8xbf16> to vector<1x1x8x8xbf16>
    tpu.vector_store %arg9[%c0_57, %c3_58, %c0_59, %c0_60], %93 {strides = array<i32>} : memref<1x4x8x8xbf16, #tpu.memory_space<vmem>>, vector<1x1x8x8xbf16>,
    return
  }
  func.func @transform_0(%arg0: i32, %arg1: i32) -> (i32, i32, i32) {
    %c0_i32 = arith.constant 0 : i32
    %c0_i32_0 = arith.constant 0 : i32
    return %arg0, %arg1, %c0_i32 : i32, i32, i32
  }
  func.func @transform_1(%arg0: i32, %arg1: i32) -> (i32, i32) {
    %c0_i32 = arith.constant 0 : i32
    %c0_i32_0 = arith.constant 0 : i32
    %c0_i32_1 = arith.constant 0 : i32
    return %c0_i32, %c0_i32_0 : i32, i32
  }
  func.func @transform_2(%arg0: i32, %arg1: i32) -> (i32, i32) {
    %c0_i32 = arith.constant 0 : i32
    %c0_i32_0 = arith.constant 0 : i32
    %c0_i32_1 = arith.constant 0 : i32
    return %c0_i32, %c0_i32_0 : i32, i32
  }
  func.func @transform_3(%arg0: i32, %arg1: i32) -> (i32, i32) {
    %c0_i32 = arith.constant 0 : i32
    %c0_i32_0 = arith.constant 0 : i32
    %c0_i32_1 = arith.constant 0 : i32
    return %c0_i32, %c0_i32_0 : i32, i32
  }
  func.func @transform_4(%arg0: i32, %arg1: i32) -> (i32, i32) {
    %c0_i32 = arith.constant 0 : i32
    %c0_i32_0 = arith.constant 0 : i32
    %c0_i32_1 = arith.constant 0 : i32
    return %c0_i32, %c0_i32_0 : i32, i32
  }
  func.func @transform_5(%arg0: i32, %arg1: i32) -> (i32, i32, i32, i32) {
    %c0_i32 = arith.constant 0 : i32
    %c0_i32_0 = arith.constant 0 : i32
    %c0_i32_1 = arith.constant 0 : i32
    return %arg0, %c0_i32, %arg1, %c0_i32_0 : i32, i32, i32, i32
  }
  func.func @transform_6(%arg0: i32, %arg1: i32) -> (i32, i32, i32, i32) {
    %c0_i32 = arith.constant 0 : i32
    %c0_i32_0 = arith.constant 0 : i32
    %c0_i32_1 = arith.constant 0 : i32
    return %arg0, %c0_i32, %arg1, %c0_i32_0 : i32, i32, i32, i32
  }
  func.func @transform_7(%arg0: i32, %arg1: i32) -> (i32, i32, i32, i32) {
    %c0_i32 = arith.constant 0 : i32
    %c0_i32_0 = arith.constant 0 : i32
    %c0_i32_1 = arith.constant 0 : i32
    return %arg0, %c0_i32, %arg1, %c0_i32_0 : i32, i32, i32, i32
  }
}

</mosaic_0001>

<bundles_post_ra>
// kernel: tpu_custom_call.1
= control target key start
LH: loop header
LB: loop body
LE: loop exit
PB: predicated region body
PF: predicated region fallthrough
CT: control target
= control target key end

     0   :  { %s1456_s0 = inlined_call_operand.hbm [shape: f32[2,8,32], index: 0, kind: input, shape index: {}]   ;;  %s1457_s1 = inlined_call_operand.vmem [shape: f32[1,32], index: 1, kind: input, shape index: {}]   ;;  %s1458_s2 = inlined_call_operand.vmem [shape: f32[1,32], index: 2, kind: input, shape index: {}]   ;;  %s1459_s3 = inlined_call_operand.hbm [shape: bf16[32,96], index: 3, kind: input, shape index: {}]   ;;  %s1460_s4 = inlined_call_operand.vmem [shape: f32[1,96], index: 4, kind: input, shape index: {}]   ;;  %s1461_s5 = inlined_call_operand.hbm [shape: bf16[2,4,8,8], index: 5, kind: output, shape index: {0}]   ;;  %s1462_s6 = inlined_call_operand.hbm [shape: bf16[2,4,8,8], index: 6, kind: output, shape index: {1}]   ;;  %s1463_s7 = inlined_call_operand.hbm [shape: bf16[2,4,8,8], index: 7, kind: output, shape index: {2}]  }
   0x1   :  { %1469 = sst [smem:[#allocation18_spill]] %s1459_s3 }
   0x2   :  { %13 = vsyncpa [#allocation3], 0 }
   0x3   :  { %15 = vsyncpa [#allocation3 + $0x1], 0 }
   0x4   :  { %16 = vsyncpa [#allocation6], 0 }
   0x5   :  { %17 = vsyncpa [#allocation4], 0 }
   0x6   :  { %19 = vsyncpa [#allocation4 + $0x1], 0 }
   0x7   :  { %20 = vsyncpa [#allocation9], 0 }
   0x8   :  { %22 = vsyncpa [#allocation9 + $0x1], 0  ;;  %s1157_s24 = smov 0   ;;  %s1159_s25 = smov 0  }
   0x9   :  { %s1161_s26 = smov 0   ;;  %s1163_s27 = smov 0  }
   0xa   :  { %s1165_s28 = smov 0   ;;  %s1167_s29 = smov 0  }
   0xb LB: > { %1470 = sst [smem:[#allocation15_spill]] %s1090_s28  ;;  %s1188_s30 = sadd.s32 4294967295, %s1094_s29   ;;  %s1094_s29 = sphi %s1167_s29, %s28_s29   ;;  %s1090_s28 = sphi %s1165_s28, %s1489_s28   ;;  %s1086_s27 = sphi %s1163_s27, %s1488_s27   ;;  %s1082_s26 = sphi %s1161_s26, %s1492_s26   ;;  %s1078_s25 = sphi %s1159_s25, %s1491_s25   ;;  %s1074_s24 = sphi %s1157_s24, %s1490_s24  }
   0xc   : > { %s1464_s8 = sadd.s32 4294967294, %s1094_s29   ;;  %p62_p0 = scmp.ne.s32.totalorder %s1078_s25, %s1074_s24 }
   0xd   : > { %p1468_p1 = scmp.eq.s32.totalorder %s1188_s30, 0  ;;  %p178_p3 = scmp.eq.s32.totalorder %s1464_s8, 1 }
   0xe   : > { %p740_p5 = scmp.ge.s32.totalorder %s1094_s29, 1  ;;  %p241_p7 = scmp.lt.s32.totalorder %s1094_s29, 3 }
   0xf   : > { %p1199_p4 = por %p1468_p1, %p62_p0  ;;  %p1204_p6 = por %p178_p3, %p62_p0 }
  0x10   : > { %p1209_p8 = pnand %p740_p5, %p241_p7  ;;  %s1096_s12 = smov [#allocation5]  }
  0x11   : > { %s1472_s10 = scalar_select %p1204_p6, 1, 0 }
  0x12   : > { %s259_s13 = sshll.u32 %s1096_s12, 4  ;;  %p807_p9 = pneg %p1209_p8  ;;  %s260_s13 = int_to_ptr.vmem [resolvable:$true] %s259_s13 }
  0x13   : > { %1473 = sst [smem:[#allocation16_spill]] %s1472_s10  ;;  %s40_s15 = sadd.s32 1, %s1090_s28 }
  0x14   : > { %p1218_p11 = pnand %p807_p9, %p1468_p1  ;;  %s911_s16 = scalar_lea.vmem %s260_s13, 256 }
  0x15   : > { %p912_p13 = scmp.ne.s32.totalorder %s260_s13, %s911_s16  ;;  %p919_p5 = scmp.lt.s32.totalorder %s260_s13, %s260_s13 }
  0x16   : > { %p902_p12 = pneg %p1218_p11  ;;  %p920_p7 = scmp.lt.s32.totalorder %s911_s16, %s911_s16 }
  0x18   : > { %p914_p0 = pnand %p912_p13, %p902_p12  ;;  %p921_p2 = por %p920_p7, %p919_p5 }
  0x1a   : > { %p915_p3 = pneg %p914_p0 }
  0x1c   : > { %p922_p6 = pnand %p921_p2, %p915_p3 }
  0x1e   : > { %925 = shalt.err (!%p922_p6)
}
  0x1f   : > { %s1097_s17 = smov 64   ;;  %s1098_s18 = smov 4  }
  0x20   : > { %s1476_s3 = sld [smem:[#allocation18_spill]]  ;;  %p42_p2 = scmp.ge.s32.totalorder %s40_s15, 2 }
  0x21   : > { %s49_s21 = sadd.s32 1, %s1082_s26  ;;  %p56_p6 = scmp.ne.s32.totalorder %s1082_s26, %s1078_s25 }
  0x22   : > { %p57_p9 = scmp.eq.s32.totalorder %s1094_s29, 0  ;;  %s1494_s15 = smov (%p42_p2, %s40_s15), 0 }
  0x23   : > { %1477 = sst [smem:[#allocation17_spill]] %s1494_s15  ;;  %p1479_p13 = scmp.eq.s32.totalorder %s1188_s30, 1 }
  0x24   : > { %p1236_p12 = por %p57_p9, %p56_p6  ;;  %s44_s12 = ssub.s32 %s1090_s28, %s1494_s15 }
  0x25   : > { %p1242_p0 = por %p1479_p13, %p56_p6  ;;  %p826_p3 = scmp.lt.s32.totalorder %s1094_s29, 2 }
  0x26   : > { %810 = dma.hbm_to_vmem [thread:$0]  (!%p1218_p11), %s1476_s3, 256, %s260_s13, [#allocation6], %s1097_s17, %s1097_s17, %s1098_s18  }
  0x27   : > { %p47_p11 = scmp.eq.s32.totalorder %s44_s12, 0  ;;  %s276_s13 = sand.u32 1, %s1082_s26  }
  0x28   : > { %s743_s14 = sshll.u32 %s276_s13, 3  ;;  %s744_s17 = sshll.u32 %s1090_s28, 7 }
  0x29   : > { %s1251_s16 = scalar_select %p47_p11, %s1082_s26, %s49_s21  }
  0x2a   : > { %s286_s20 = scalar_lea.hbm %s1456_s0, %s744_s17  ;;  %s280_s8 = scalar_lea.vmem [#allocation2], %s743_s14 }
  0x2b   : > { %s288_s3 = sshll.u32 %s280_s8, 4  ;;  %p1259_p5 = pnand %p826_p3, %p1236_p12  ;;  %s289_s3 = int_to_ptr.vmem [resolvable:$true] %s288_s3 }
  0x2c   : > { %s277_s15 = scalar_lea.sflag [#allocation3], %s276_s13  ;;  %s939_s12 = scalar_lea.vmem %s289_s3, 128 }
  0x2d   : > { %p928_p7 = pneg %p1259_p5  ;;  %p940_p2 = scmp.ne.s32.totalorder %s289_s3, %s939_s12 }
  0x2e   : > { %s1099_s21 = smov [#allocation2]  }
  0x2f   : > { %p942_p6 = pnand %p940_p2, %p928_p7  ;;  %s944_s28 = sshll.u32 %s1099_s21, 4  ;;  %s945_s28 = int_to_ptr.vmem [resolvable:$false] %s944_s28 }
  0x30   : > { %s946_s17 = scalar_lea.vmem %s945_s28, 256  ;;  %p947_p13 = scmp.lt.s32.totalorder %s289_s3, %s945_s28 }
  0x31   : > { %p943_p9 = pneg %p942_p6  ;;  %p948_p11 = scmp.lt.s32.totalorder %s946_s17, %s939_s12 }
  0x33   : > { %p949_p10 = por %p948_p11, %p947_p13 }
  0x35   : > { %p950_p1 = pnand %p949_p10, %p943_p9 }
  0x37   : > { %953 = shalt.err (!%p950_p1)
}
  0x38   : > { %814 = dma.hbm_to_vmem [thread:$0]  (!%p1259_p5), %s286_s20, 128, %s289_s3, %s277_s15  }
  0x39   : > { %297 = sbr.rel (%p1209_p8) target bundleno = 777 (0x309), region = 40  ;;  %s1270_s8 = sand.u32 (!%p1209_p8), 1, %s1078_s25  }
  0x3a   : > { %s746_s22 = sshll.u32 (!%p1209_p8), %s1270_s8, 3  ;;  %s300_s13 = scalar_lea.sflag (!%p1209_p8), [#allocation3], %s1270_s8 }
  0x3b   : > { %s303_s14 = scalar_lea.vmem (!%p1209_p8), [#allocation2], %s746_s22 }
  0x3e   : > { %1057 = dma.done.wait (%p1199_p4), %s300_s13, 128  }
  0x3f   : > { %1059 = vsyncadd (%p1199_p4), %s300_s13, 4294967168  ;;  %p1482_p1 = scmp.eq.s32.totalorder %s1188_s30, 0 }
  0x41   : > { %1061 = dma.done.wait (%p1482_p1), [#allocation6], 256   ;;  %p1483_p10 = pmov %p1482_p1 }
  0x42   : > { %vm352_vm0 = vcmask 261120   ;;  %v349_v0 = vld [vmem:[%s303_s14] sm:$0xff]  ;;  %v894_v7 = vld [vmem:[#allocation5 + $0x8] sm:$0xff]   ;;  %v1100_v8 = vmov 0.0   ;;  %vm1101_vm1 = vmmov 0   ;;  %v895_v9 = vld [vmem:[#allocation5] sm:$0xff]  }
  0x43   : > { %1063 = vsyncadd (%p1483_p10), [#allocation6], 4294967040  ;;  %v353_v1 = vsel %vm352_vm0, %v349_v0, 0.0  ;;  %787 = vmatprep.subr.bf16.mxu0 %v1100_v8  ;;  %791 = vmatprep.mubr.msk.bf16.mxu0 %vm1101_vm1, %v1100_v8  ;;  %v751_v18 = vld [vmem:[%s1457_s1] ss:$0 sm:$0xff]  ;;  %s1295_s18 = sshll.u32 %s1270_s8, 4 }
  0x44   : > { %354 = vadd.xlane.f32.xlu0 %v353_v1  ;;  %788 = vmatpush3.bf16.msra.mxu0 %v894_v7  ;;  %v752_v21 = vld [vmem:[%s1458_s2] ss:$0 sm:$0xff]  ;;  %vm459_vm4 = vcmask 60416   ;;  %s1102_s19 = smov 80   ;;  %s1103_s20 = smov 96  }
  0x45   : > { %789 = vmatprep.subr.bf16.mxu0 %v1100_v8  ;;  %v753_v25 = vld [vmem:[%s1460_s4] ss:$0 sm:$0xff]  ;;  %s1298_s12 = scalar_lea.vmem [#allocation7], %s1295_s18  ;;  %s1104_s21 = smov 88  }
  0x46   : > { %s1105_s17 = smov 104   ;;  %s1106_s22 = smov 72  }
  0x47   : > { %s1107_s13 = smov 64   ;;  %s1108_s14 = smov 56  }
  0x48   : > { %790 = vmatpush3.bf16.msra.mxu0 %v895_v9  ;;  %s1109_s3 = smov 48   ;;  %s1110_s28 = smov 120  }
  0x49   : > { %s1111_s9 = smov 112   ;;  %s1112_s10 = smov 40  }
  0x4a   : > { %s340_s11 = scalar_lea.vmem [#allocation8], %s1295_s18 }
  0x4b   : > { %s562_s15 = sshll.u32 %s340_s11, 4  ;;  %s1313_s15 = int_to_ptr.vmem [resolvable:$true] %s562_s15 }
  0xcd   : > { %v355_v2 = vpop.xlane.xlu0 %354 }
  0xce   : > { %v357_v3 = vmul.f32 0.03125, %v355_v2 }
  0xd0   : > { %v358_v4 = vsub.f32 %v349_v0, %v357_v3 }
  0xd2   : > { %v359_v5 = vmul.f32 %v358_v4, %v358_v4  ;;  %v371_v19 = vmul.f32 %v751_v18, %v358_v4 }
  0xd4   : > { %v360_v6 = vsel %vm352_vm0, %v359_v5, 0.0 }
  0xd5   : > { %361 = vadd.xlane.f32.xlu0 %v360_v6 }
 0x15e   : > { %v362_v10 = vpop.xlane.xlu0 %361 }
 0x15f   : > { %v364_v11 = vmul.f32 0.032258064, %v362_v10 }
 0x161   : > { %896 = vrsqrt.f32 %v364_v11  ;;  %vm374_vm2 = vcmp.eq.f32.partialorder %v364_v11, inf  ;;  %v377_v14 = vand.u32 2147483648, %v364_v11  ;;  %vm376_vm3 = vcmp.eq.f32.partialorder %v364_v11, 0.0 }
 0x16e   : > { %v897_v12 = vpop.eup %896 }
 0x16f   : > { %v373_v13 = vmul.f32 %v897_v12, %v364_v11 }
 0x171   : > { %v375_v15 = vsel %vm374_vm2, %v364_v11, %v373_v13 }
 0x172   : > { %v378_v16 = vsel %vm376_vm3, %v377_v14, %v375_v15 }
 0x173   : > { %v379_v17 = vadd.f32 1e-06, %v378_v16 }
 0x175   : > { %898 = vrcp.f32 %v379_v17 }
 0x182   : > { %v899_v20 = vpop.eup %898 }
 0x183   : > { %v381_v22 = vmul.f32 %v899_v20, %v371_v19 }
 0x185   : > { %v388_v23 = vadd.f32 %v752_v21, %v381_v22 }
 0x187   : > { %v389_v24 = vpack.c.bf16 %v388_v23, %v388_v23 }
 0x189   : > { %792 = vmatmul.mubr.msk.bf16.vlgmr.msra.gmra.mxu0 %vm352_vm0, %v389_v24 }
 0x249   : > { %v450_v26 = vpop.f32.mrf.mxu0 }
 0x24a   : > { %v451_v27 = vadd.f32 %v753_v25, %v450_v26 }
 0x24b   : > { %v793_v28 = vpop.f32.mrf.mxu0 }
 0x24c   : > { %v456_v29 = vmul.f32 0.35355338, %v451_v27  ;;  %v779_v30 = vpack.c.bf16 %v451_v27, %v451_v27 }
 0x24d   : > { %v453_v31 = vpop.f32.mrf.mxu0 }
 0x24e   : > { %v457_v32 = vpack.c.bf16 %v456_v29, %v456_v29  ;;  %495 = vrot.lane.b32.xlu0 %v779_v30, %s1102_s19  ;;  %464 = vrot.lane.b32.xlu1 %v779_v30, %s1103_s20  ;;  %s525_s19 = sand.u32 1, %s1188_s30   ;;  %s1308_s20 = sshll.u32 %s1086_s27, 8 }
 0x24f   : > { %v794_v33 = vpop.f32.mrf.mxu0  ;;  %s1322_s27 = scalar_lea.sflag [#allocation9], %s525_s19  ;;  %s954_s30 = scalar_lea.vmem %s1313_s15, 256 }
 0x250   : > { %460 = vst.msk [vmem:[%s1298_s12] sm:$0xf] %vm459_vm4, %v457_v32  ;;  %p955_p4 = scmp.ne.s32.totalorder %s1313_s15, %s954_s30 }
 0x252   : > { %480 = vrot.lane.b32.xlu1 %v779_v30, %s1104_s21  ;;  %505 = vrot.lane.b32.xlu0 %v457_v32, %s1105_s17  ;;  %p956_p8 = pnand %p955_p4, %p1242_p0 }
 0x254   : > { %p957_p12 = pneg %p956_p8 }
 0x256   : > { %510 = vrot.lane.b32.xlu1 %v779_v30, %s1106_s22  ;;  %s1319_s22 = scalar_lea.hbm %s1462_s6, %s1308_s20 }
 0x25a   : > { %468 = vrot.lane.b32.xlu1 %v779_v30, %s1107_s13 }
 0x25e   : > { %485 = vrot.lane.b32.xlu1 %v779_v30, %s1108_s14  ;;  %s1113_s14 = smov [#allocation8]  }
 0x262   : > { %500 = vrot.lane.b32.xlu1 %v779_v30, %s1109_s3  ;;  %s958_s3 = sshll.u32 %s1113_s14, 4  ;;  %s959_s3 = int_to_ptr.vmem [resolvable:$false] %s958_s3 }
 0x263   : > { %p961_p3 = scmp.lt.s32.totalorder %s1313_s15, %s959_s3 }
 0x266   : > { %475 = vrot.lane.b32.xlu1 %v457_v32, %s1110_s28  ;;  %s960_s28 = scalar_lea.vmem %s959_s3, 512 }
 0x267   : > { %p962_p5 = scmp.lt.s32.totalorder %s960_s28, %s954_s30 }
 0x269   : > { %p963_p7 = por %p962_p5, %p961_p3 }
 0x26a   : > { %490 = vrot.lane.b32.xlu1 %v457_v32, %s1111_s9 }
 0x26b   : > { %p964_p2 = pnand %p963_p7, %p957_p12 }
 0x26e   : > { %515 = vrot.lane.b32.xlu1 %v779_v30, %s1112_s10 }
 0x2c0   : > { %v496_v34 = vpop.permute.xlu0 %495  ;;  %v465_v35 = vpop.permute.xlu1 %464 }
 0x2c1   : > { %763 = vst.msk [vmem:[%s340_s11 + $0x8] sm:$0xf] %vm459_vm4, %v496_v34  ;;  %467 = vst.msk [vmem:[%s340_s11] sm:$0xf] %vm459_vm4, %v465_v35 }
 0x2c4   : > { %v481_v36 = vpop.permute.xlu1 %480  ;;  %v506_v37 = vpop.permute.xlu0 %505 }
 0x2c5   : > { %760 = vst.msk [vmem:[%s340_s11 + $0x4] sm:$0xf] %vm459_vm4, %v481_v36  ;;  %765 = vst.msk [vmem:[%s1298_s12 + $0xc] sm:$0xf] %vm459_vm4, %v506_v37 }
 0x2c8   : > { %v511_v38 = vpop.permute.xlu1 %510 }
 0x2c9   : > { %766 = vst.msk [vmem:[%s340_s11 + $0xc] sm:$0xf] %vm459_vm4, %v511_v38 }
 0x2ca   : > { %967 = shalt.err (!%p964_p2)
}
 0x2cb   : > { %s968_s9 = scalar_lea.hbm %s1319_s22, 256  ;;  %s972_s19 = scalar_lea.hbm %s1462_s6, 512 }
 0x2cc   : > { %p969_p6 = scmp.ne.s32.totalorder %s1319_s22, %s968_s9  ;;  %p973_p11 = scmp.lt.s32.totalorder %s1319_s22, %s1462_s6 }
 0x2cd   : > { %p974_p1 = scmp.lt.s32.totalorder %s972_s19, %s968_s9 }
 0x2ce   : > { %p970_p9 = pnand %p969_p6, %p1242_p0 }
 0x2cf   : > { %p975_p10 = por %p974_p1, %p973_p11 }
 0x2d0   : > { %p971_p13 = pneg %p970_p9 }
 0x2d2   : > { %p976_p4 = pnand %p975_p10, %p971_p13 }
 0x2d4   : > { %979 = shalt.err (!%p976_p4)
}
 0x2d5   : > { %s1114_s30 = smov 4   ;;  %v469_v39 = vpop.permute.xlu1 %468  ;;  %s1349_s14 = scalar_lea.vmem [#allocation10], %s1295_s18 }
 0x2d6   : > { %802 = dma.vmem_to_hbm [thread:$0]  (%p1242_p0), %s1313_s15, 256, %s1319_s22, %s1322_s27, %s1107_s13, %s1107_s13, %s1114_s30  }
 0x2d7   : > { %471 = vst.msk [vmem:[%s1349_s14] sm:$0xf] %vm459_vm4, %v469_v39  ;;  %s545_s3 = sshll.u32 %s1298_s12, 4  ;;  %s1366_s22 = scalar_lea.hbm %s1461_s5, %s1308_s20  ;;  %s1360_s3 = int_to_ptr.vmem [resolvable:$true] %s545_s3 }
 0x2d8   : > { %s579_s28 = sshll.u32 %s1349_s14, 4  ;;  %s521_s9 = scalar_lea.sflag [#allocation4], %s1270_s8  ;;  %s1397_s28 = int_to_ptr.vmem [resolvable:$true] %s579_s28 }
 0x2d9   : > { %v486_v40 = vpop.permute.xlu1 %485  ;;  %s980_s10 = scalar_lea.vmem %s1360_s3, 256  ;;  %s1115_s11 = smov [#allocation7]  }
 0x2da   : > { %761 = vst.msk [vmem:[%s1349_s14 + $0x4] sm:$0xf] %vm459_vm4, %v486_v40  ;;  %p981_p8 = scmp.ne.s32.totalorder %s1360_s3, %s980_s10  ;;  %s984_s19 = sshll.u32 %s1115_s11, 4  ;;  %s985_s19 = int_to_ptr.vmem [resolvable:$false] %s984_s19 }
 0x2db   : > { %s986_s21 = scalar_lea.vmem %s985_s19, 512  ;;  %p987_p5 = scmp.lt.s32.totalorder %s1360_s3, %s985_s19 }
 0x2dc   : > { %p982_p12 = pnand %p981_p8, %p1242_p0  ;;  %p988_p7 = scmp.lt.s32.totalorder %s986_s21, %s980_s10 }
 0x2dd   : > { %v501_v41 = vpop.permute.xlu1 %500 }
 0x2de   : > { %764 = vst.msk [vmem:[%s1349_s14 + $0x8] sm:$0xf] %vm459_vm4, %v501_v41  ;;  %p983_p3 = pneg %p982_p12  ;;  %p989_p2 = por %p988_p7, %p987_p5 }
 0x2e0   : > { %p990_p6 = pnand %p989_p2, %p983_p3 }
 0x2e1   : > { %v476_v42 = vpop.permute.xlu1 %475 }
 0x2e2   : > { %759 = vst.msk [vmem:[%s1298_s12 + $0x4] sm:$0xf] %vm459_vm4, %v476_v42 }
 0x2e5   : > { %v491_v43 = vpop.permute.xlu1 %490 }
 0x2e6   : > { %762 = vst.msk [vmem:[%s1298_s12 + $0x8] sm:$0xf] %vm459_vm4, %v491_v43 }
 0x2e7   : > { %993 = shalt.err (!%p990_p6)
}
 0x2e8   : > { %s994_s12 = scalar_lea.hbm %s1366_s22, 256  ;;  %s998_s18 = scalar_lea.hbm %s1461_s5, 512 }
 0x2e9   : > { %p995_p9 = scmp.ne.s32.totalorder %s1366_s22, %s994_s12  ;;  %p999_p1 = scmp.lt.s32.totalorder %s1366_s22, %s1461_s5 }
 0x2ea   : > { %p1000_p10 = scmp.lt.s32.totalorder %s998_s18, %s994_s12 }
 0x2eb   : > { %p996_p13 = pnand %p995_p9, %p1242_p0 }
 0x2ec   : > { %p1001_p4 = por %p1000_p10, %p999_p1 }
 0x2ed   : > { %p997_p11 = pneg %p996_p13 }
 0x2ef   : > { %p1002_p8 = pnand %p1001_p4, %p997_p11 }
 0x2f1   : > { %1005 = shalt.err (!%p1002_p8)
}
 0x2f2   : > { %801 = dma.vmem_to_hbm [thread:$0]  (%p1242_p0), %s1360_s3, 256, %s1366_s22, %s521_s9, %s1107_s13, %s1107_s13, %s1114_s30   ;;  %v516_v44 = vpop.permute.xlu1 %515 }
 0x2f3   : > { %s1403_s21 = scalar_lea.hbm %s1463_s7, %s1308_s20  ;;  %767 = vst.msk [vmem:[%s1349_s14 + $0xc] sm:$0xf] %vm459_vm4, %v516_v44  ;;  %s1006_s12 = scalar_lea.vmem %s1397_s28, 256 }
 0x2f4   : > { %p1007_p12 = scmp.ne.s32.totalorder %s1397_s28, %s1006_s12  ;;  %s1116_s3 = smov [#allocation10]  }
 0x2f5   : > { %s1010_s22 = sshll.u32 %s1116_s3, 4  ;;  %s1011_s22 = int_to_ptr.vmem [resolvable:$false] %s1010_s22 }
 0x2f6   : > { %p1008_p3 = pnand %p1007_p12, %p1242_p0  ;;  %s1012_s9 = scalar_lea.vmem %s1011_s22, 512 }
 0x2f7   : > { %p1013_p7 = scmp.lt.s32.totalorder %s1397_s28, %s1011_s22  ;;  %p1014_p2 = scmp.lt.s32.totalorder %s1012_s9, %s1006_s12 }
 0x2f8   : > { %p1009_p5 = pneg %p1008_p3 }
 0x2f9   : > { %p1015_p6 = por %p1014_p2, %p1013_p7 }
 0x2fb   : > { %p1016_p9 = pnand %p1015_p6, %p1009_p5 }
 0x2fd   : > { %1019 = shalt.err (!%p1016_p9)
}
 0x2fe   : > { %s1020_s20 = scalar_lea.hbm %s1403_s21, 256  ;;  %s1024_s17 = scalar_lea.hbm %s1463_s7, 512 }
 0x2ff   : > { %p1021_p13 = scmp.ne.s32.totalorder %s1403_s21, %s1020_s20  ;;  %p1025_p10 = scmp.lt.s32.totalorder %s1403_s21, %s1463_s7 }
 0x300   : > { %p1026_p4 = scmp.lt.s32.totalorder %s1024_s17, %s1020_s20 }
 0x301   : > { %p1022_p11 = pnand %p1021_p13, %p1242_p0 }
 0x302   : > { %p1027_p8 = por %p1026_p4, %p1025_p10 }
 0x303   : > { %p1023_p1 = pneg %p1022_p11 }
 0x305   : > { %p1028_p12 = pnand %p1027_p8, %p1023_p1 }
 0x307   : > { %1031 = shalt.err (!%p1028_p12)
}
 0x308   : > { %803 = dma.vmem_to_hbm [thread:$0]  (%p1242_p0), %s1397_s28, 256, %s1403_s21, %s1322_s27, %s1107_s13, %s1107_s13, %s1114_s30  }
 0x309 PF: > { %s1484_s11 = sld [smem:[#allocation16_spill]]  ;;  %s594_s10 = sand.u32 1, %s1074_s24  }
 0x30a   : > { %p1486_p5 = scmp.ge.s32.totalorder %s1094_s29, 2  ;;  %s595_s19 = scalar_lea.sflag [#allocation4], %s594_s10 }
 0x30f   : > { %p1485_p3 = scmp.ne.s32.totalorder %s1484_s11, 0 }
 0x311   : > { %p816_p7 = pnand %p1486_p5, %p1485_p3 }
 0x313   : > { %p817_p2 = pneg %p816_p7 }
 0x315   : > { %1065 = dma.done.wait (%p817_p2), %s595_s19, 256  }
 0x316   : > { %1067 = vsyncadd (%p817_p2), %s595_s19, 4294967040  ;;  %s1487_s23 = sadd.s32 4294967294, %s1094_s29  }
 0x317   : > { %s603_s12 = sand.u32 1, %s1487_s23  }
 0x318   : > { %s604_s3 = scalar_lea.sflag [#allocation9], %s603_s12 }
 0x319   : > { %1069 = dma.done.wait (%p817_p2), %s604_s3, 512  }
 0x31a   : > { %1071 = vsyncadd (%p817_p2), %s604_s3, 4294966784  ;;  %s28_s29 = sadd.s32 1, %s1094_s29   ;;  %s1488_s27 = sld [smem:[#allocation15_spill]] }
 0x31b   : > { %p25_p0 = scmp.ge.s32.totalorder %s28_s29, 4   ;;  %s1489_s28 = sld [smem:[#allocation17_spill]] }
 0x31c   : > { %s1490_s24 = smov %s1078_s25  ;;  %s1491_s25 = smov %s1082_s26 }
 0x31d   : > { %s1492_s26 = smov %s1251_s16  ;;  %27 = sbr.rel (!%p25_p0) target bundleno = 11 (0xb), region = 130 }
 0x322   :  { %618 = vsyncpa [#allocation3], 1 }
 0x323   :  { %620 = vsyncpa [#allocation3 + $0x1], 1 }
 0x324   :  { %621 = vsyncpa [#allocation6], 1 }
 0x325   :  { %622 = vsyncpa [#allocation4], 1 }
 0x326   :  { %624 = vsyncpa [#allocation4 + $0x1], 1 }
 0x327   :  { %625 = vsyncpa [#allocation9], 1 }
 0x328   :  { %627 = vsyncpa [#allocation9 + $0x1], 1 }

</bundles_post_ra>
